<compile_context>
chip_gen: v6e
topology: v6e:2x2x1
jax: 0.10.0
libtpu: 0.0.40
codegen_flags: <defaults>
</compile_context>

<pallas_src>
import math

import jax
import jax.numpy as jnp
from jax import lax
from jax.experimental import pallas as pl
from jax.experimental.pallas import tpu as pltpu

_LANE = 128
_HAS_BUFFERED = hasattr(pl, "Buffered")


def _cdiv(a, b):
    return -(-a // b)


def _round_up(x, m):
    return _cdiv(x, m) * m


def _linear_exp_kernel(x_ref, w_ref, b_ref, o_ref):
    # Single-K-block path: full contraction in one dot, fused bias + exp.
    # x_ref: [TM, TK], w_ref: [TN, TK] (native nn.Linear layout), b_ref: [1, TN]
    acc = lax.dot_general(
        x_ref[...],
        w_ref[...],
        dimension_numbers=(((1,), (1,)), ((), ())),  # contract last dims (NT)
        preferred_element_type=jnp.float32,
    )
    o_ref[...] = jnp.exp(acc + b_ref[...]).astype(o_ref.dtype)


def _linear_exp_kernel_acc(x_ref, w_ref, b_ref, o_ref, acc_ref):
    # K-streaming path: accumulate partial products, finalize with bias + exp.
    k = pl.program_id(2)

    @pl.when(k == 0)
    def _():
        acc_ref[...] = jnp.zeros_like(acc_ref)

    acc_ref[...] += lax.dot_general(
        x_ref[...],
        w_ref[...],
        dimension_numbers=(((1,), (1,)), ((), ())),
        preferred_element_type=jnp.float32,
    )

    @pl.when(k == pl.num_programs(2) - 1)
    def _():
        o_ref[...] = jnp.exp(acc_ref[...] + b_ref[...]).astype(o_ref.dtype)


def linear_output_forward(x, weight, bias, *, max_k_tile=None, max_n_tile=None,
                          vmem_budget_bytes=40 * 1024 * 1024):
    """exp(x @ W^T + b) with x: [..., D_in], W: [D_out, D_in], b: [D_out]."""
    d_in = x.shape[-1]
    d_out = weight.shape[0]
    lead = x.shape[:-1]
    m = math.prod(lead) if lead else 1

    in_item = jnp.dtype(x.dtype).itemsize
    w_item = jnp.dtype(weight.dtype).itemsize
    b_item = jnp.dtype(bias.dtype).itemsize
    sublane = max(8, 32 // in_item)  # 8 for f32, 16 for bf16, 32 for int8

    # ---- K / N tiling ------------------------------------------------------
    k_lane = _round_up(d_in, _LANE)
    # Weight-resident strategy whenever a single-buffered weight fits a
    # comfortable fraction of the VMEM budget; otherwise stream N / K tiles.
    resident = (k_lane * d_out * w_item) <= (vmem_budget_bytes * 6) // 10
    if max_k_tile is None:
        max_k_tile = k_lane if resident else 1024
    if max_n_tile is None:
        max_n_tile = _round_up(d_out, _LANE) if resident else 1024

    if k_lane <= max_k_tile:
        tk, k_tot, grid_k = k_lane, k_lane, 1
    else:
        tk = max(_LANE, (max_k_tile // _LANE) * _LANE)
        k_tot = _round_up(d_in, tk)       # K must stay zero-padded when split
        grid_k = k_tot // tk

    tn = min(_round_up(d_out, _LANE), max(_LANE, (max_n_tile // _LANE) * _LANE))
    grid_n = _cdiv(d_out, tn)

    # ---- operand layout (pad K with zeros only when needed; never pad N) ---
    x2d = x.reshape(m, d_in)
    if k_tot != d_in:
        x2d = jnp.pad(x2d, ((0, 0), (0, k_tot - d_in)))
        w2d = jnp.pad(weight, ((0, 0), (0, k_tot - d_in)))
    else:
        w2d = weight
    b2d = bias.reshape(1, d_out)

    cost = pl.CostEstimate(
        flops=2 * m * d_in * d_out,
        transcendentals=m * d_out,
        bytes_accessed=(m * d_in + d_in * d_out + d_out + m * d_out) * in_item,
    )

    def run(single_buffer):
        # Buffer counts for the grid-invariant operands.
        w_bufs = 1 if (single_buffer and grid_n == 1 and grid_k == 1) else 2
        b_bufs = 1 if (single_buffer and grid_n == 1) else 2

        fixed = w_bufs * tn * tk * w_item + b_bufs * tn * b_item
        per_row = (2 * tk * in_item + 2 * tn * in_item
                   + (4 * tn if grid_k > 1 else 0))
        tm = max(sublane, (vmem_budget_bytes - fixed) // per_row)
        # Cap so there are at least two M tiles when possible (v7x megacore).
        tm = min(tm, 2048, max(sublane, _round_up(_cdiv(m, 2), sublane)))
        tm = max(sublane, (tm // sublane) * sublane)
        grid_m = _cdiv(m, tm)

        need = fixed + tm * per_row
        vmem_limit = min(max(need + need // 4 + (2 << 20), 16 << 20), 64 << 20)

        def spec(shape, index_map, single):
            if single and _HAS_BUFFERED:
                return pl.BlockSpec(shape, index_map,
                                    pipeline_mode=pl.Buffered(1))
            return pl.BlockSpec(shape, index_map)

        if grid_k == 1:
            grid = (grid_m, grid_n)
            in_specs = [
                pl.BlockSpec((tm, tk), lambda i, j: (i, 0)),
                spec((tn, tk), lambda i, j: (j, 0), w_bufs == 1),
                spec((1, tn), lambda i, j: (0, j), b_bufs == 1),
            ]
            out_specs = pl.BlockSpec((tm, tn), lambda i, j: (i, j))
            kernel = _linear_exp_kernel
            scratch = ()
            semantics = ("parallel", "parallel")
        else:
            grid = (grid_m, grid_n, grid_k)
            in_specs = [
                pl.BlockSpec((tm, tk), lambda i, j, k: (i, k)),
                spec((tn, tk), lambda i, j, k: (j, k), w_bufs == 1),
                spec((1, tn), lambda i, j, k: (0, j), b_bufs == 1),
            ]
            out_specs = pl.BlockSpec((tm, tn), lambda i, j, k: (i, j))
            kernel = _linear_exp_kernel_acc
            scratch = (pltpu.VMEM((tm, tn), jnp.float32),)
            semantics = ("parallel", "parallel", "arbitrary")

        return pl.pallas_call(
            kernel,
            out_shape=jax.ShapeDtypeStruct((m, d_out), x.dtype),
            grid_spec=pltpu.PrefetchScalarGridSpec(
                num_scalar_prefetch=0,
                grid=grid,
                in_specs=in_specs,
                out_specs=out_specs,
                scratch_shapes=scratch,
            ),
            compiler_params=pltpu.CompilerParams(
                dimension_semantics=semantics,
                vmem_limit_bytes=int(vmem_limit),
            ),
            cost_estimate=cost,
        )(x2d, w2d, b2d)

    want_single = _HAS_BUFFERED and grid_n == 1
    if want_single:
        try:
            out2d = run(True)
        except Exception:  # pragma: no cover - jax without Buffered(1) support
            out2d = run(False)
    else:
        out2d = run(False)

    # TODO(synk): exp() can overflow narrow output dtypes (bf16/fp16) for large
    # logits after the f32 epilogue; this matches the PyTorch reference.
    return out2d.reshape(*lead, d_out)


if __name__ == "__main__":
    # Small shapes consistent with the module's forward.
    B, S = 2, 8
    mha_output_dim = 32    # D_in
    model_output_dim = 16  # D_out

    key = jax.random.PRNGKey(0)
    kx, kw, kb = jax.random.split(key, 3)

    x = jax.random.normal(kx, (B, S, mha_output_dim), dtype=jnp.float32)
    bound = 1.0 / math.sqrt(mha_output_dim)
    weight = jax.random.uniform(
        kw, (model_output_dim, mha_output_dim), jnp.float32, -bound, bound)
    bias = jax.random.uniform(
        kb, (model_output_dim,), jnp.float32, -bound, bound)

    out = jax.block_until_ready(linear_output_forward(x, weight, bias))
    ref = jnp.exp(x @ weight.T + bias)
    assert out.shape == (B, S, model_output_dim)
    assert jnp.allclose(out, ref, rtol=1e-4, atol=1e-6)

    # Partial last M tile (m = 303 rows, no wrapper-side row padding/slicing).
    x2 = jax.random.normal(
        jax.random.PRNGKey(1), (3, 101, mha_output_dim), dtype=jnp.float32)
    out2 = jax.block_until_ready(linear_output_forward(x2, weight, bias))
    ref2 = jnp.exp(x2 @ weight.T + bias)
    assert out2.shape == (3, 101, model_output_dim)
    assert jnp.allclose(out2, ref2, rtol=1e-4, atol=1e-6)

    # K-streaming path (grid_k > 1, accumulator kernel, K zero-pad 200 -> 256).
    d_in3, d_out3 = 200, 16
    k3x, k3w, k3b = jax.random.split(jax.random.PRNGKey(2), 3)
    x3 = jax.random.normal(k3x, (4, 7, d_in3), dtype=jnp.float32)
    w3 = jax.random.uniform(k3w, (d_out3, d_in3), jnp.float32, -0.1, 0.1)
    b3 = jax.random.uniform(k3b, (d_out3,), jnp.float32, -0.1, 0.1)
    out3 = jax.block_until_ready(
        linear_output_forward(x3, w3, b3, max_k_tile=128))
    ref3 = jnp.exp(x3 @ w3.T + b3)
    assert jnp.allclose(out3, ref3, rtol=1e-4, atol=1e-6)

    # N-streaming path (grid_n > 1, partial last N tile, no N padding).
    d_in4, d_out4 = 32, 300
    k4x, k4w, k4b = jax.random.split(jax.random.PRNGKey(3), 3)
    x4 = jax.random.normal(k4x, (2, 9, d_in4), dtype=jnp.float32)
    w4 = jax.random.uniform(k4w, (d_out4, d_in4), jnp.float32, -0.1, 0.1)
    b4 = jax.random.uniform(k4b, (d_out4,), jnp.float32, -0.1, 0.1)
    out4 = jax.block_until_ready(
        linear_output_forward(x4, w4, b4, max_n_tile=128))
    ref4 = jnp.exp(x4 @ w4.T + b4)
    assert jnp.allclose(out4, ref4, rtol=1e-4, atol=1e-6)

    print("KERNEL_OK")
</pallas_src>

<mosaic_0001>
module attributes {stable_mosaic.version = 11 : i64} {
  func.func @_linear_exp_kernel(%arg0: i32, %arg1: i32, %arg2: memref<8x128xf32, #tpu.memory_space<vmem>>, %arg3: memref<128x128xf32, #tpu.memory_space<vmem>>, %arg4: memref<1x128xf32, #tpu.memory_space<vmem>>, %arg5: memref<8x128xf32, #tpu.memory_space<vmem>>) attributes {dimension_semantics = [#tpu.dimension_semantics<parallel>, #tpu.dimension_semantics<parallel>], iteration_bounds = array<i64: 2, 1>, scalar_prefetch = 0 : i64, scratch_operands = 0 : i64, tpu.core_type = #tpu.core_type<tc>, window_params = [{transform_indices = @transform_0, window_bounds = array<i64: 8, 128>}, {pipeline_mode = #tpu.pipeline_mode<synchronous>, transform_indices = @transform_1, window_bounds = array<i64: 128, 128>}, {pipeline_mode = #tpu.pipeline_mode<synchronous>, transform_indices = @transform_2, window_bounds = array<i64: 1, 128>}, {transform_indices = @transform_3, window_bounds = array<i64: 8, 128>}]} {
    %c0 = arith.constant 0 : index
    %c0_0 = arith.constant 0 : index
    %0 = vector.load %arg2[%c0, %c0_0] : memref<8x128xf32, #tpu.memory_space<vmem>>, vector<8x128xf32>
    %c0_1 = arith.constant 0 : index
    %c0_2 = arith.constant 0 : index
    %1 = vector.load %arg3[%c0_1, %c0_2] : memref<128x128xf32, #tpu.memory_space<vmem>>, vector<128x128xf32>
    %cst = arith.constant dense<0.000000e+00> : vector<8x128xf32>
    %2 = tpu.matmul %0, %1, %cst {dimension_numbers = #tpu.dot_dimension_numbers<[1], [1], [0], [0], [0, 0, 1, 0], [], []>} : vector<8x128xf32>, vector<128x128xf32>, vector<8x128xf32> -> vector<8x128xf32>
    %c0_3 = arith.constant 0 : index
    %c0_4 = arith.constant 0 : index
    %3 = vector.load %arg4[%c0_3, %c0_4] : memref<1x128xf32, #tpu.memory_space<vmem>>, vector<1x128xf32>
    %4 = vector.broadcast %3 : vector<1x128xf32> to vector<8x128xf32>
    %5 = arith.addf %2, %4 : vector<8x128xf32>
    %6 = math.exp %5 : vector<8x128xf32>
    %c0_5 = arith.constant 0 : index
    %c0_6 = arith.constant 0 : index
    %7 = vector.load %arg5[%c0_5, %c0_6] : memref<8x128xf32, #tpu.memory_space<vmem>>, vector<8x128xf32>
    tpu.vector_store %arg5[%c0_5, %c0_6], %6 {strides = array<i32>} : memref<8x128xf32, #tpu.memory_space<vmem>>, vector<8x128xf32>,
    return
  }
  func.func @transform_0(%arg0: i32, %arg1: i32) -> (i32, i32) {
    %c0_i32 = arith.constant 0 : i32
    %c0_i32_0 = arith.constant 0 : i32
    return %arg0, %c0_i32 : i32, i32
  }
  func.func @transform_1(%arg0: i32, %arg1: i32) -> (i32, i32) {
    %c0_i32 = arith.constant 0 : i32
    %c0_i32_0 = arith.constant 0 : i32
    return %arg1, %c0_i32 : i32, i32
  }
  func.func @transform_2(%arg0: i32, %arg1: i32) -> (i32, i32) {
    %c0_i32 = arith.constant 0 : i32
    %c0_i32_0 = arith.constant 0 : i32
    return %c0_i32, %arg1 : i32, i32
  }
  func.func @transform_3(%arg0: i32, %arg1: i32) -> (i32, i32) {
    %c0_i32 = arith.constant 0 : i32
    return %arg0, %arg1 : i32, i32
  }
}

module attributes {stable_mosaic.version = 11 : i64} {
  func.func @_linear_exp_kernel(%arg0: i32, %arg1: i32, %arg2: memref<8x128xf32, #tpu.memory_space<vmem>>, %arg3: memref<128x128xf32, #tpu.memory_space<vmem>>, %arg4: memref<1x128xf32, #tpu.memory_space<vmem>>, %arg5: memref<8x128xf32, #tpu.memory_space<vmem>>) attributes {dimension_semantics = [#tpu.dimension_semantics<parallel>, #tpu.dimension_semantics<parallel>], iteration_bounds = array<i64: 2, 1>, scalar_prefetch = 0 : i64, scratch_operands = 0 : i64, tpu.core_type = #tpu.core_type<tc>, window_params = [{transform_indices = @transform_0, window_bounds = array<i64: 8, 128>}, {transform_indices = @transform_1, window_bounds = array<i64: 128, 128>}, {transform_indices = @transform_2, window_bounds = array<i64: 1, 128>}, {transform_indices = @transform_3, window_bounds = array<i64: 8, 128>}]} {
    %c0 = arith.constant 0 : index
    %c0_0 = arith.constant 0 : index
    %0 = vector.load %arg2[%c0, %c0_0] : memref<8x128xf32, #tpu.memory_space<vmem>>, vector<8x128xf32>
    %c0_1 = arith.constant 0 : index
    %c0_2 = arith.constant 0 : index
    %1 = vector.load %arg3[%c0_1, %c0_2] : memref<128x128xf32, #tpu.memory_space<vmem>>, vector<128x128xf32>
    %cst = arith.constant dense<0.000000e+00> : vector<8x128xf32>
    %2 = tpu.matmul %0, %1, %cst {dimension_numbers = #tpu.dot_dimension_numbers<[1], [1], [0], [0], [0, 0, 1, 0], [], []>} : vector<8x128xf32>, vector<128x128xf32>, vector<8x128xf32> -> vector<8x128xf32>
    %c0_3 = arith.constant 0 : index
    %c0_4 = arith.constant 0 : index
    %3 = vector.load %arg4[%c0_3, %c0_4] : memref<1x128xf32, #tpu.memory_space<vmem>>, vector<1x128xf32>
    %4 = vector.broadcast %3 : vector<1x128xf32> to vector<8x128xf32>
    %5 = arith.addf %2, %4 : vector<8x128xf32>
    %6 = math.exp %5 : vector<8x128xf32>
    %c0_5 = arith.constant 0 : index
    %c0_6 = arith.constant 0 : index
    %7 = vector.load %arg5[%c0_5, %c0_6] : memref<8x128xf32, #tpu.memory_space<vmem>>, vector<8x128xf32>
    tpu.vector_store %arg5[%c0_5, %c0_6], %6 {strides = array<i32>} : memref<8x128xf32, #tpu.memory_space<vmem>>, vector<8x128xf32>,
    return
  }
  func.func @transform_0(%arg0: i32, %arg1: i32) -> (i32, i32) {
    %c0_i32 = arith.constant 0 : i32
    %c0_i32_0 = arith.constant 0 : i32
    return %arg0, %c0_i32 : i32, i32
  }
  func.func @transform_1(%arg0: i32, %arg1: i32) -> (i32, i32) {
    %c0_i32 = arith.constant 0 : i32
    %c0_i32_0 = arith.constant 0 : i32
    return %arg1, %c0_i32 : i32, i32
  }
  func.func @transform_2(%arg0: i32, %arg1: i32) -> (i32, i32) {
    %c0_i32 = arith.constant 0 : i32
    %c0_i32_0 = arith.constant 0 : i32
    return %c0_i32, %arg1 : i32, i32
  }
  func.func @transform_3(%arg0: i32, %arg1: i32) -> (i32, i32) {
    %c0_i32 = arith.constant 0 : i32
    return %arg0, %arg1 : i32, i32
  }
}

</mosaic_0001>

<bundles_post_ra>
// kernel: tpu_custom_call.1
= control target key start
LH: loop header
LB: loop body
LE: loop exit
PB: predicated region body
PF: predicated region fallthrough
CT: control target
= control target key end

     0   :  { %8 = vsyncpa [#allocation3], 0  ;;  %s929_s0 = inlined_call_operand.hbm [shape: f32[16,128], index: 0, kind: input, shape index: {}]   ;;  %s930_s1 = inlined_call_operand.hbm [shape: f32[16,128], index: 1, kind: input, shape index: {}]   ;;  %s931_s2 = inlined_call_operand.vmem [shape: f32[1,16], index: 2, kind: input, shape index: {}]   ;;  %s932_s3 = inlined_call_operand.hbm [shape: f32[16,16], index: 3, kind: output, shape index: {}]  }
   0x1   :  { %10 = vsyncpa [#allocation3 + $0x1], 0 }
   0x2   :  { %11 = vsyncpa [#allocation6], 0 }
   0x3   :  { %12 = vsyncpa [#allocation4], 0 }
   0x4   :  { %14 = vsyncpa [#allocation4 + $0x1], 0  ;;  %s761_s12 = smov 0   ;;  %s763_s13 = smov 0  }
   0x5   :  { %s765_s14 = smov 0   ;;  %s767_s15 = smov 0  }
   0x6   :  { %s769_s16 = smov 0   ;;  %s771_s17 = smov 0  }
   0x7 LB: > { %s792_s18 = sadd.s32 4294967295, %s732_s17   ;;  %s460_s19 = sadd.s32 4294967294, %s732_s17   ;;  %s732_s17 = sphi %s771_s17, %s20_s17   ;;  %s728_s16 = sphi %s769_s16, %s947_s16   ;;  %s724_s15 = sphi %s767_s15, %s946_s15   ;;  %s720_s14 = sphi %s765_s14, %s945_s14   ;;  %s716_s13 = sphi %s763_s13, %s944_s13   ;;  %s712_s12 = sphi %s761_s12, %s943_s12  }
   0x8   : > { %s32_s20 = sadd.s32 1, %s728_s16  ;;  %s39_s21 = sadd.s32 1, %s720_s14 }
   0x9   : > { %p34_p0 = scmp.ge.s32.totalorder %s32_s20, 2  ;;  %p46_p1 = scmp.ne.s32.totalorder %s720_s14, %s716_s13 }
   0xa   : > { %p47_p2 = scmp.eq.s32.totalorder %s732_s17, 0  ;;  %p52_p3 = scmp.ne.s32.totalorder %s716_s13, %s712_s12 }
   0xb   : > { %s949_s20 = smov (%p34_p0, %s32_s20), 0  ;;  %p933_p5 = scmp.eq.s32.totalorder %s792_s18, 0 }
   0xc   : > { %p804_p4 = por %p47_p2, %p46_p1  ;;  %s36_s23 = ssub.s32 %s728_s16, %s949_s20 }
   0xd   : > { %p130_p6 = scmp.eq.s32.totalorder %s792_s18, 1  ;;  %p37_p7 = scmp.eq.s32.totalorder %s36_s23, 0 }
   0xe   : > { %p814_p8 = por %p933_p5, %p52_p3  ;;  %p136_p10 = scmp.eq.s32.totalorder %s460_s19, 1 }
   0xf   : > { %p818_p9 = por %p130_p6, %p46_p1  ;;  %p461_p12 = scmp.ge.s32.totalorder %s732_s17, 1 }
  0x10   : > { %s823_s26 = scalar_select %p37_p7, %s720_s14, %s39_s21  }
  0x11   : > { %p825_p11 = por %p136_p10, %p52_p3  ;;  %p143_p13 = scmp.lt.s32.totalorder %s732_s17, 3 }
  0x13   : > { %p831_p0 = pnand %p461_p12, %p143_p13 }
  0x14   : > { %p462_p1 = scmp.ne.s32.totalorder (!%p831_p0), %s792_s18, 0 }
  0x15   : > { %147 = sbr.rel (%p831_p0) target bundleno = 44 (0x2c), region = 12 }
  0x1a   : > { %151 = sbr.rel (%p462_p1) target bundleno = 44 (0x2c), region = 16 }
  0x1f   : > { %157 = vsyncadd [#allocation6], 1792  ;;  %s734_s29 = smov [#allocation5]  }
  0x20   : > { %s162_s30 = sshll.u32 %s734_s29, 4  ;;  %s163_s30 = int_to_ptr.vmem [resolvable:$true] %s162_s30 }
  0x21   : > { %s608_s4 = scalar_lea.vmem %s163_s30, 256  ;;  %s612_s5 = scalar_lea.vmem %s163_s30, 2048 }
  0x22   : > { %p609_p2 = scmp.ne.s32.totalorder %s163_s30, %s608_s4  ;;  %p613_p3 = scmp.lt.s32.totalorder %s163_s30, %s163_s30 }
  0x23   : > { %p614_p6 = scmp.lt.s32.totalorder %s612_s5, %s608_s4 }
  0x25   : > { %p615_p7 = por %p614_p6, %p613_p3 }
  0x27   : > { %p616_p10 = pnand %p615_p7, %p609_p2 }
  0x29   : > { %619 = shalt.err (!%p616_p10)
}
  0x2a   : > { %s735_s6 = smov 128   ;;  %s736_s7 = smov 8  }
  0x2b   : > { %168 = dma.hbm_to_vmem [thread:$0]  %s930_s1, 256, %s163_s30, [#allocation6], %s735_s6, %s735_s6, %s736_s7  }
  0x2c PF: > { %p542_p13 = scmp.lt.s32.totalorder %s732_s17, 2  ;;  %s182_s10 = sand.u32 1, %s720_s14  }
  0x2d   : > { %s466_s11 = sshll.u32 %s728_s16, 7  ;;  %s465_s19 = sshll.u32 %s182_s10, 3 }
  0x2e   : > { %s191_s29 = scalar_lea.hbm %s929_s0, %s466_s11  ;;  %s186_s4 = scalar_lea.vmem [#allocation2], %s465_s19 }
  0x2f   : > { %s193_s5 = sshll.u32 %s186_s4, 4  ;;  %p850_p1 = pnand %p542_p13, %p804_p4  ;;  %s194_s5 = int_to_ptr.vmem [resolvable:$true] %s193_s5 }
  0x30   : > { %s183_s6 = scalar_lea.sflag [#allocation3], %s182_s10  ;;  %s633_s7 = scalar_lea.vmem %s194_s5, 128 }
  0x31   : > { %p622_p2 = pneg %p850_p1  ;;  %p634_p3 = scmp.ne.s32.totalorder %s194_s5, %s633_s7 }
  0x32   : > { %s737_s8 = smov [#allocation2]  }
  0x33   : > { %p636_p6 = pnand %p634_p3, %p622_p2  ;;  %s638_s9 = sshll.u32 %s737_s8, 4  ;;  %s639_s9 = int_to_ptr.vmem [resolvable:$false] %s638_s9 }
  0x34   : > { %s640_s11 = scalar_lea.vmem %s639_s9, 256  ;;  %p641_p10 = scmp.lt.s32.totalorder %s194_s5, %s639_s9 }
  0x35   : > { %p637_p7 = pneg %p636_p6  ;;  %p642_p12 = scmp.lt.s32.totalorder %s640_s11, %s633_s7 }
  0x37   : > { %p643_p5 = por %p642_p12, %p641_p10 }
  0x39   : > { %p644_p4 = pnand %p643_p5, %p637_p7 }
  0x3b   : > { %647 = shalt.err (!%p644_p4)
}
  0x3c   : > { %537 = dma.hbm_to_vmem [thread:$0]  (!%p850_p1), %s191_s29, 128, %s194_s5, %s183_s6  }
  0x3d   : > { %202 = sbr.rel (%p831_p0) target bundleno = 359 (0x167), region = 32  ;;  %s861_s22 = sand.u32 (!%p831_p0), 1, %s716_s13  }
  0x3e   : > { %s468_s10 = sshll.u32 (!%p831_p0), %s861_s22, 3  ;;  %s205_s19 = scalar_lea.sflag (!%p831_p0), [#allocation3], %s861_s22 }
  0x3f   : > { %s867_s21 = scalar_lea.vmem (!%p831_p0), [#allocation2], %s468_s10 }
  0x42   : > { %699 = dma.done.wait (%p814_p8), %s205_s19, 128  }
  0x43   : > { %701 = vsyncadd (%p814_p8), %s205_s19, 4294967168  ;;  %p940_p5 = scmp.eq.s32.totalorder %s792_s18, 0 }
  0x45   : > { %703 = dma.done.wait (%p940_p5), [#allocation6], 2048   ;;  %p941_p0 = pmov %p940_p5 }
  0x46   : > { %v738_v0 = vmov 0.0   ;;  %vm739_vm0 = vmmov 0   ;;  %v260_v1 = vld [vmem:[#allocation5 + $0x78] sm:$0xff]  ;;  %v259_v2 = vld [vmem:[#allocation5 + $0x70] sm:$0xff]  ;;  %v258_v3 = vld [vmem:[#allocation5 + $0x68] sm:$0xff]  ;;  %s473_s28 = sshll.u32 %s724_s15, 7 }
  0x47   : > { %705 = vsyncadd (%p941_p0), [#allocation6], 4294965248  ;;  %493 = vmatprep.subr.mxu0 %v738_v0  ;;  %525 = vmatprep.mubr.msk.f32.mxu0 %vm739_vm0, %v738_v0  ;;  %v257_v4 = vld [vmem:[#allocation5 + $0x60] sm:$0xff]  ;;  %v256_v5 = vld [vmem:[#allocation5 + $0x58] sm:$0xff]  ;;  %s237_s23 = scalar_lea.vmem [#allocation7], %s468_s10  ;;  %s887_s30 = scalar_lea.hbm %s932_s3, %s473_s28 }
  0x48   : > { %494 = vmatpush3.xpose.msra.mxu0 %v260_v1  ;;  %v255_v6 = vld [vmem:[#allocation5 + $0x50] sm:$0xff]  ;;  %v254_v7 = vld [vmem:[#allocation5 + $0x48] sm:$0xff]  ;;  %v253_v8 = vld [vmem:[#allocation5 + $0x40] sm:$0xff]  ;;  %s356_s29 = sshll.u32 %s237_s23, 4  ;;  %s342_s6 = scalar_lea.sflag [#allocation4], %s861_s22  ;;  %s357_s29 = int_to_ptr.vmem [resolvable:$true] %s356_s29 }
  0x49   : > { %495 = vmatprep.subr.mxu0 %v738_v0  ;;  %v252_v9 = vld [vmem:[#allocation5 + $0x38] sm:$0xff]  ;;  %v251_v10 = vld [vmem:[#allocation5 + $0x30] sm:$0xff]  ;;  %v250_v11 = vld [vmem:[#allocation5 + $0x28] sm:$0xff]  ;;  %s648_s7 = scalar_lea.vmem %s357_s29, 128  ;;  %s740_s8 = smov [#allocation7]  }
  0x4a   : > { %v249_v12 = vld [vmem:[#allocation5 + $0x20] sm:$0xff]  ;;  %v248_v13 = vld [vmem:[#allocation5 + $0x18] sm:$0xff]  ;;  %v247_v14 = vld [vmem:[#allocation5 + $0x10] sm:$0xff]  ;;  %p649_p8 = scmp.ne.s32.totalorder %s357_s29, %s648_s7  ;;  %s652_s9 = sshll.u32 %s740_s8, 4  ;;  %s653_s9 = int_to_ptr.vmem [resolvable:$false] %s652_s9 }
  0x4b   : > { %v246_v15 = vld [vmem:[#allocation5 + $0x8] sm:$0xff]  ;;  %v245_v16 = vld [vmem:[#allocation5] sm:$0xff]  ;;  %v244_v17 = vld [vmem:[%s867_s21] sm:$0xff]  ;;  %s654_s15 = scalar_lea.vmem %s653_s9, 256  ;;  %p655_p1 = scmp.lt.s32.totalorder %s357_s29, %s653_s9 }
  0x4c   : > { %496 = vmatpush3.xpose.msra.mxu0 %v259_v2  ;;  %v471_v18 = vld [vmem:[%s931_s2] ss:$0 sm:$0xff]  ;;  %p650_p12 = pnand %p649_p8, %p818_p9  ;;  %p656_p2 = scmp.lt.s32.totalorder %s654_s15, %s648_s7 }
  0x4d   : > { %497 = vmatprep.subr.mxu0 %v738_v0 }
  0x4e   : > { %p651_p13 = pneg %p650_p12  ;;  %p657_p3 = por %p656_p2, %p655_p1 }
  0x50   : > { %498 = vmatpush3.xpose.msra.mxu0 %v258_v3  ;;  %p658_p6 = pnand %p657_p3, %p651_p13 }
  0x51   : > { %499 = vmatprep.subr.mxu0 %v738_v0 }
  0x54   : > { %500 = vmatpush3.xpose.msra.mxu0 %v257_v4 }
  0x55   : > { %501 = vmatprep.subr.mxu0 %v738_v0 }
  0x58   : > { %502 = vmatpush3.xpose.msra.mxu0 %v256_v5 }
  0x59   : > { %503 = vmatprep.subr.mxu0 %v738_v0 }
  0x5c   : > { %504 = vmatpush3.xpose.msra.mxu0 %v255_v6 }
  0x5d   : > { %505 = vmatprep.subr.mxu0 %v738_v0 }
  0x60   : > { %506 = vmatpush3.xpose.msra.mxu0 %v254_v7 }
  0x61   : > { %507 = vmatprep.subr.mxu0 %v738_v0 }
  0x64   : > { %508 = vmatpush3.xpose.msra.mxu0 %v253_v8 }
  0x65   : > { %509 = vmatprep.subr.mxu0 %v738_v0 }
  0x68   : > { %510 = vmatpush3.xpose.msra.mxu0 %v252_v9 }
  0x69   : > { %511 = vmatprep.subr.mxu0 %v738_v0 }
  0x6c   : > { %512 = vmatpush3.xpose.msra.mxu0 %v251_v10 }
  0x6d   : > { %513 = vmatprep.subr.mxu0 %v738_v0 }
  0x70   : > { %514 = vmatpush3.xpose.msra.mxu0 %v250_v11 }
  0x71   : > { %515 = vmatprep.subr.mxu0 %v738_v0 }
  0x74   : > { %516 = vmatpush3.xpose.msra.mxu0 %v249_v12 }
  0x75   : > { %517 = vmatprep.subr.mxu0 %v738_v0 }
  0x78   : > { %518 = vmatpush3.xpose.msra.mxu0 %v248_v13 }
  0x79   : > { %519 = vmatprep.subr.mxu0 %v738_v0 }
  0x7c   : > { %520 = vmatpush3.xpose.msra.mxu0 %v247_v14 }
  0x7d   : > { %521 = vmatprep.subr.mxu0 %v738_v0 }
  0x80   : > { %522 = vmatpush3.xpose.msra.mxu0 %v246_v15 }
  0x81   : > { %523 = vmatprep.subr.mxu0 %v738_v0 }
  0x84   : > { %524 = vmatpush3.xpose.msra.mxu0 %v245_v16 }
  0x87   : > { %526 = vmatmul.mubr.f32.vlgmr.msra.gmra.mxu0 %v244_v17 }
 0x147   : > { %v334_v19 = vpop.f32.mrf.mxu0 }
 0x148   : > { %v335_v20 = vadd.f32 %v471_v18, %v334_v19 }
 0x149   : > { %v527_v21 = vpop.f32.mrf.mxu0 }
 0x14a   : > { %v338_v22 = vmul.f32 1.442695, %v335_v20 }
 0x14c   : > { %598 = vpow2.f32 %v338_v22 }
 0x159   : > { %v599_v23 = vpop.eup %598 }
 0x15a   : > { %340 = vst [vmem:[%s237_s23] sm:$0xff] %v599_v23 }
 0x15b   : > { %661 = shalt.err (!%p658_p6)
}
 0x15c   : > { %s662_s11 = scalar_lea.hbm %s887_s30, 128  ;;  %s666_s19 = scalar_lea.hbm %s932_s3, 256 }
 0x15d   : > { %p663_p7 = scmp.ne.s32.totalorder %s887_s30, %s662_s11  ;;  %p667_p5 = scmp.lt.s32.totalorder %s887_s30, %s932_s3 }
 0x15e   : > { %p668_p0 = scmp.lt.s32.totalorder %s666_s19, %s662_s11 }
 0x15f   : > { %p664_p10 = pnand %p663_p7, %p818_p9 }
 0x160   : > { %p669_p8 = por %p668_p0, %p667_p5 }
 0x161   : > { %p665_p4 = pneg %p664_p10 }
 0x163   : > { %p670_p12 = pnand %p669_p8, %p665_p4 }
 0x165   : > { %673 = shalt.err (!%p670_p12)
}
 0x166   : > { %532 = dma.vmem_to_hbm [thread:$0]  (%p818_p9), %s357_s29, 128, %s887_s30, %s342_s6  }
 0x167 PF: > { %s368_s24 = sand.u32 1, %s712_s12   ;;  %p942_p13 = scmp.ge.s32.totalorder %s732_s17, 2 }
 0x168   : > { %s369_s28 = scalar_lea.sflag [#allocation4], %s368_s24 }
 0x169   : > { %p539_p1 = pnand %p942_p13, %p825_p11 }
 0x16b   : > { %p540_p2 = pneg %p539_p1 }
 0x16d   : > { %707 = dma.done.wait (%p540_p2), %s369_s28, 128  }
 0x16e   : > { %709 = vsyncadd (%p540_p2), %s369_s28, 4294967168  ;;  %s20_s17 = sadd.s32 1, %s732_s17   ;;  %s943_s12 = smov %s716_s13 }
 0x16f   : > { %p17_p3 = scmp.ge.s32.totalorder %s20_s17, 4   ;;  %s944_s13 = smov %s720_s14 }
 0x170   : > { %s945_s14 = smov %s823_s26  ;;  %s946_s15 = smov %s728_s16 }
 0x171   : > { %s947_s16 = smov %s949_s20  ;;  %19 = sbr.rel (!%p17_p3) target bundleno = 7 (0x7), region = 85 }
 0x176   :  { %374 = vsyncpa [#allocation3], 1 }
 0x177   :  { %376 = vsyncpa [#allocation3 + $0x1], 1 }
 0x178   :  { %377 = vsyncpa [#allocation6], 1 }
 0x179   :  { %378 = vsyncpa [#allocation4], 1 }
 0x17a   :  { %380 = vsyncpa [#allocation4 + $0x1], 1 }

// kernel: tpu_custom_call.1
= control target key start
LH: loop header
LB: loop body
LE: loop exit
PB: predicated region body
PF: predicated region fallthrough
CT: control target
= control target key end

     0   :  { %8 = vsyncpa [#allocation3], 0  ;;  %s929_s0 = inlined_call_operand.hbm [shape: f32[16,128], index: 0, kind: input, shape index: {}]   ;;  %s930_s1 = inlined_call_operand.hbm [shape: f32[16,128], index: 1, kind: input, shape index: {}]   ;;  %s931_s2 = inlined_call_operand.vmem [shape: f32[1,16], index: 2, kind: input, shape index: {}]   ;;  %s932_s3 = inlined_call_operand.hbm [shape: f32[16,16], index: 3, kind: output, shape index: {}]  }
   0x1   :  { %10 = vsyncpa [#allocation3 + $0x1], 0 }
   0x2   :  { %11 = vsyncpa [#allocation6], 0 }
   0x3   :  { %12 = vsyncpa [#allocation4], 0 }
   0x4   :  { %14 = vsyncpa [#allocation4 + $0x1], 0  ;;  %s761_s12 = smov 0   ;;  %s763_s13 = smov 0  }
   0x5   :  { %s765_s14 = smov 0   ;;  %s767_s15 = smov 0  }
   0x6   :  { %s769_s16 = smov 0   ;;  %s771_s17 = smov 0  }
   0x7 LB: > { %s792_s18 = sadd.s32 4294967295, %s732_s17   ;;  %s460_s19 = sadd.s32 4294967294, %s732_s17   ;;  %s732_s17 = sphi %s771_s17, %s20_s17   ;;  %s728_s16 = sphi %s769_s16, %s947_s16   ;;  %s724_s15 = sphi %s767_s15, %s946_s15   ;;  %s720_s14 = sphi %s765_s14, %s945_s14   ;;  %s716_s13 = sphi %s763_s13, %s944_s13   ;;  %s712_s12 = sphi %s761_s12, %s943_s12  }
   0x8   : > { %s32_s20 = sadd.s32 1, %s728_s16  ;;  %s39_s21 = sadd.s32 1, %s720_s14 }
   0x9   : > { %p34_p0 = scmp.ge.s32.totalorder %s32_s20, 2  ;;  %p46_p1 = scmp.ne.s32.totalorder %s720_s14, %s716_s13 }
   0xa   : > { %p47_p2 = scmp.eq.s32.totalorder %s732_s17, 0  ;;  %p52_p3 = scmp.ne.s32.totalorder %s716_s13, %s712_s12 }
   0xb   : > { %s949_s20 = smov (%p34_p0, %s32_s20), 0  ;;  %p933_p5 = scmp.eq.s32.totalorder %s792_s18, 0 }
   0xc   : > { %p804_p4 = por %p47_p2, %p46_p1  ;;  %s36_s23 = ssub.s32 %s728_s16, %s949_s20 }
   0xd   : > { %p130_p6 = scmp.eq.s32.totalorder %s792_s18, 1  ;;  %p37_p7 = scmp.eq.s32.totalorder %s36_s23, 0 }
   0xe   : > { %p814_p8 = por %p933_p5, %p52_p3  ;;  %p136_p10 = scmp.eq.s32.totalorder %s460_s19, 1 }
   0xf   : > { %p818_p9 = por %p130_p6, %p46_p1  ;;  %p461_p12 = scmp.ge.s32.totalorder %s732_s17, 1 }
  0x10   : > { %s823_s26 = scalar_select %p37_p7, %s720_s14, %s39_s21  }
  0x11   : > { %p825_p11 = por %p136_p10, %p52_p3  ;;  %p143_p13 = scmp.lt.s32.totalorder %s732_s17, 3 }
  0x13   : > { %p831_p0 = pnand %p461_p12, %p143_p13 }
  0x14   : > { %p462_p1 = scmp.ne.s32.totalorder (!%p831_p0), %s792_s18, 0 }
  0x15   : > { %147 = sbr.rel (%p831_p0) target bundleno = 44 (0x2c), region = 12 }
  0x1a   : > { %151 = sbr.rel (%p462_p1) target bundleno = 44 (0x2c), region = 16 }
  0x1f   : > { %157 = vsyncadd [#allocation6], 1792  ;;  %s734_s29 = smov [#allocation5]  }
  0x20   : > { %s162_s30 = sshll.u32 %s734_s29, 4  ;;  %s163_s30 = int_to_ptr.vmem [resolvable:$true] %s162_s30 }
  0x21   : > { %s608_s4 = scalar_lea.vmem %s163_s30, 256  ;;  %s612_s5 = scalar_lea.vmem %s163_s30, 2048 }
  0x22   : > { %p609_p2 = scmp.ne.s32.totalorder %s163_s30, %s608_s4  ;;  %p613_p3 = scmp.lt.s32.totalorder %s163_s30, %s163_s30 }
  0x23   : > { %p614_p6 = scmp.lt.s32.totalorder %s612_s5, %s608_s4 }
  0x25   : > { %p615_p7 = por %p614_p6, %p613_p3 }
  0x27   : > { %p616_p10 = pnand %p615_p7, %p609_p2 }
  0x29   : > { %619 = shalt.err (!%p616_p10)
}
  0x2a   : > { %s735_s6 = smov 128   ;;  %s736_s7 = smov 8  }
  0x2b   : > { %168 = dma.hbm_to_vmem [thread:$0]  %s930_s1, 256, %s163_s30, [#allocation6], %s735_s6, %s735_s6, %s736_s7  }
  0x2c PF: > { %p542_p13 = scmp.lt.s32.totalorder %s732_s17, 2  ;;  %s182_s10 = sand.u32 1, %s720_s14  }
  0x2d   : > { %s466_s11 = sshll.u32 %s728_s16, 7  ;;  %s465_s19 = sshll.u32 %s182_s10, 3 }
  0x2e   : > { %s191_s29 = scalar_lea.hbm %s929_s0, %s466_s11  ;;  %s186_s4 = scalar_lea.vmem [#allocation2], %s465_s19 }
  0x2f   : > { %s193_s5 = sshll.u32 %s186_s4, 4  ;;  %p850_p1 = pnand %p542_p13, %p804_p4  ;;  %s194_s5 = int_to_ptr.vmem [resolvable:$true] %s193_s5 }
  0x30   : > { %s183_s6 = scalar_lea.sflag [#allocation3], %s182_s10  ;;  %s633_s7 = scalar_lea.vmem %s194_s5, 128 }
  0x31   : > { %p622_p2 = pneg %p850_p1  ;;  %p634_p3 = scmp.ne.s32.totalorder %s194_s5, %s633_s7 }
  0x32   : > { %s737_s8 = smov [#allocation2]  }
  0x33   : > { %p636_p6 = pnand %p634_p3, %p622_p2  ;;  %s638_s9 = sshll.u32 %s737_s8, 4  ;;  %s639_s9 = int_to_ptr.vmem [resolvable:$false] %s638_s9 }
  0x34   : > { %s640_s11 = scalar_lea.vmem %s639_s9, 256  ;;  %p641_p10 = scmp.lt.s32.totalorder %s194_s5, %s639_s9 }
  0x35   : > { %p637_p7 = pneg %p636_p6  ;;  %p642_p12 = scmp.lt.s32.totalorder %s640_s11, %s633_s7 }
  0x37   : > { %p643_p5 = por %p642_p12, %p641_p10 }
  0x39   : > { %p644_p4 = pnand %p643_p5, %p637_p7 }
  0x3b   : > { %647 = shalt.err (!%p644_p4)
}
  0x3c   : > { %537 = dma.hbm_to_vmem [thread:$0]  (!%p850_p1), %s191_s29, 128, %s194_s5, %s183_s6  }
  0x3d   : > { %202 = sbr.rel (%p831_p0) target bundleno = 359 (0x167), region = 32  ;;  %s861_s22 = sand.u32 (!%p831_p0), 1, %s716_s13  }
  0x3e   : > { %s468_s10 = sshll.u32 (!%p831_p0), %s861_s22, 3  ;;  %s205_s19 = scalar_lea.sflag (!%p831_p0), [#allocation3], %s861_s22 }
  0x3f   : > { %s867_s21 = scalar_lea.vmem (!%p831_p0), [#allocation2], %s468_s10 }
  0x42   : > { %699 = dma.done.wait (%p814_p8), %s205_s19, 128  }
  0x43   : > { %701 = vsyncadd (%p814_p8), %s205_s19, 4294967168  ;;  %p940_p5 = scmp.eq.s32.totalorder %s792_s18, 0 }
  0x45   : > { %703 = dma.done.wait (%p940_p5), [#allocation6], 2048   ;;  %p941_p0 = pmov %p940_p5 }
  0x46   : > { %v738_v0 = vmov 0.0   ;;  %vm739_vm0 = vmmov 0   ;;  %v260_v1 = vld [vmem:[#allocation5 + $0x78] sm:$0xff]  ;;  %v259_v2 = vld [vmem:[#allocation5 + $0x70] sm:$0xff]  ;;  %v258_v3 = vld [vmem:[#allocation5 + $0x68] sm:$0xff]  ;;  %s473_s28 = sshll.u32 %s724_s15, 7 }
  0x47   : > { %705 = vsyncadd (%p941_p0), [#allocation6], 4294965248  ;;  %493 = vmatprep.subr.mxu0 %v738_v0  ;;  %525 = vmatprep.mubr.msk.f32.mxu0 %vm739_vm0, %v738_v0  ;;  %v257_v4 = vld [vmem:[#allocation5 + $0x60] sm:$0xff]  ;;  %v256_v5 = vld [vmem:[#allocation5 + $0x58] sm:$0xff]  ;;  %s237_s23 = scalar_lea.vmem [#allocation7], %s468_s10  ;;  %s887_s30 = scalar_lea.hbm %s932_s3, %s473_s28 }
  0x48   : > { %494 = vmatpush3.xpose.msra.mxu0 %v260_v1  ;;  %v255_v6 = vld [vmem:[#allocation5 + $0x50] sm:$0xff]  ;;  %v254_v7 = vld [vmem:[#allocation5 + $0x48] sm:$0xff]  ;;  %v253_v8 = vld [vmem:[#allocation5 + $0x40] sm:$0xff]  ;;  %s356_s29 = sshll.u32 %s237_s23, 4  ;;  %s342_s6 = scalar_lea.sflag [#allocation4], %s861_s22  ;;  %s357_s29 = int_to_ptr.vmem [resolvable:$true] %s356_s29 }
  0x49   : > { %495 = vmatprep.subr.mxu0 %v738_v0  ;;  %v252_v9 = vld [vmem:[#allocation5 + $0x38] sm:$0xff]  ;;  %v251_v10 = vld [vmem:[#allocation5 + $0x30] sm:$0xff]  ;;  %v250_v11 = vld [vmem:[#allocation5 + $0x28] sm:$0xff]  ;;  %s648_s7 = scalar_lea.vmem %s357_s29, 128  ;;  %s740_s8 = smov [#allocation7]  }
  0x4a   : > { %v249_v12 = vld [vmem:[#allocation5 + $0x20] sm:$0xff]  ;;  %v248_v13 = vld [vmem:[#allocation5 + $0x18] sm:$0xff]  ;;  %v247_v14 = vld [vmem:[#allocation5 + $0x10] sm:$0xff]  ;;  %p649_p8 = scmp.ne.s32.totalorder %s357_s29, %s648_s7  ;;  %s652_s9 = sshll.u32 %s740_s8, 4  ;;  %s653_s9 = int_to_ptr.vmem [resolvable:$false] %s652_s9 }
  0x4b   : > { %v246_v15 = vld [vmem:[#allocation5 + $0x8] sm:$0xff]  ;;  %v245_v16 = vld [vmem:[#allocation5] sm:$0xff]  ;;  %v244_v17 = vld [vmem:[%s867_s21] sm:$0xff]  ;;  %s654_s15 = scalar_lea.vmem %s653_s9, 256  ;;  %p655_p1 = scmp.lt.s32.totalorder %s357_s29, %s653_s9 }
  0x4c   : > { %496 = vmatpush3.xpose.msra.mxu0 %v259_v2  ;;  %v471_v18 = vld [vmem:[%s931_s2] ss:$0 sm:$0xff]  ;;  %p650_p12 = pnand %p649_p8, %p818_p9  ;;  %p656_p2 = scmp.lt.s32.totalorder %s654_s15, %s648_s7 }
  0x4d   : > { %497 = vmatprep.subr.mxu0 %v738_v0 }
  0x4e   : > { %p651_p13 = pneg %p650_p12  ;;  %p657_p3 = por %p656_p2, %p655_p1 }
  0x50   : > { %498 = vmatpush3.xpose.msra.mxu0 %v258_v3  ;;  %p658_p6 = pnand %p657_p3, %p651_p13 }
  0x51   : > { %499 = vmatprep.subr.mxu0 %v738_v0 }
  0x54   : > { %500 = vmatpush3.xpose.msra.mxu0 %v257_v4 }
  0x55   : > { %501 = vmatprep.subr.mxu0 %v738_v0 }
  0x58   : > { %502 = vmatpush3.xpose.msra.mxu0 %v256_v5 }
  0x59   : > { %503 = vmatprep.subr.mxu0 %v738_v0 }
  0x5c   : > { %504 = vmatpush3.xpose.msra.mxu0 %v255_v6 }
  0x5d   : > { %505 = vmatprep.subr.mxu0 %v738_v0 }
  0x60   : > { %506 = vmatpush3.xpose.msra.mxu0 %v254_v7 }
  0x61   : > { %507 = vmatprep.subr.mxu0 %v738_v0 }
  0x64   : > { %508 = vmatpush3.xpose.msra.mxu0 %v253_v8 }
  0x65   : > { %509 = vmatprep.subr.mxu0 %v738_v0 }
  0x68   : > { %510 = vmatpush3.xpose.msra.mxu0 %v252_v9 }
  0x69   : > { %511 = vmatprep.subr.mxu0 %v738_v0 }
  0x6c   : > { %512 = vmatpush3.xpose.msra.mxu0 %v251_v10 }
  0x6d   : > { %513 = vmatprep.subr.mxu0 %v738_v0 }
  0x70   : > { %514 = vmatpush3.xpose.msra.mxu0 %v250_v11 }
  0x71   : > { %515 = vmatprep.subr.mxu0 %v738_v0 }
  0x74   : > { %516 = vmatpush3.xpose.msra.mxu0 %v249_v12 }
  0x75   : > { %517 = vmatprep.subr.mxu0 %v738_v0 }
  0x78   : > { %518 = vmatpush3.xpose.msra.mxu0 %v248_v13 }
  0x79   : > { %519 = vmatprep.subr.mxu0 %v738_v0 }
  0x7c   : > { %520 = vmatpush3.xpose.msra.mxu0 %v247_v14 }
  0x7d   : > { %521 = vmatprep.subr.mxu0 %v738_v0 }
  0x80   : > { %522 = vmatpush3.xpose.msra.mxu0 %v246_v15 }
  0x81   : > { %523 = vmatprep.subr.mxu0 %v738_v0 }
  0x84   : > { %524 = vmatpush3.xpose.msra.mxu0 %v245_v16 }
  0x87   : > { %526 = vmatmul.mubr.f32.vlgmr.msra.gmra.mxu0 %v244_v17 }
 0x147   : > { %v334_v19 = vpop.f32.mrf.mxu0 }
 0x148   : > { %v335_v20 = vadd.f32 %v471_v18, %v334_v19 }
 0x149   : > { %v527_v21 = vpop.f32.mrf.mxu0 }
 0x14a   : > { %v338_v22 = vmul.f32 1.442695, %v335_v20 }
 0x14c   : > { %598 = vpow2.f32 %v338_v22 }
 0x159   : > { %v599_v23 = vpop.eup %598 }
 0x15a   : > { %340 = vst [vmem:[%s237_s23] sm:$0xff] %v599_v23 }
 0x15b   : > { %661 = shalt.err (!%p658_p6)
}
 0x15c   : > { %s662_s11 = scalar_lea.hbm %s887_s30, 128  ;;  %s666_s19 = scalar_lea.hbm %s932_s3, 256 }
 0x15d   : > { %p663_p7 = scmp.ne.s32.totalorder %s887_s30, %s662_s11  ;;  %p667_p5 = scmp.lt.s32.totalorder %s887_s30, %s932_s3 }
 0x15e   : > { %p668_p0 = scmp.lt.s32.totalorder %s666_s19, %s662_s11 }
 0x15f   : > { %p664_p10 = pnand %p663_p7, %p818_p9 }
 0x160   : > { %p669_p8 = por %p668_p0, %p667_p5 }
 0x161   : > { %p665_p4 = pneg %p664_p10 }
 0x163   : > { %p670_p12 = pnand %p669_p8, %p665_p4 }
 0x165   : > { %673 = shalt.err (!%p670_p12)
}
 0x166   : > { %532 = dma.vmem_to_hbm [thread:$0]  (%p818_p9), %s357_s29, 128, %s887_s30, %s342_s6  }
 0x167 PF: > { %s368_s24 = sand.u32 1, %s712_s12   ;;  %p942_p13 = scmp.ge.s32.totalorder %s732_s17, 2 }
 0x168   : > { %s369_s28 = scalar_lea.sflag [#allocation4], %s368_s24 }
 0x169   : > { %p539_p1 = pnand %p942_p13, %p825_p11 }
 0x16b   : > { %p540_p2 = pneg %p539_p1 }
 0x16d   : > { %707 = dma.done.wait (%p540_p2), %s369_s28, 128  }
 0x16e   : > { %709 = vsyncadd (%p540_p2), %s369_s28, 4294967168  ;;  %s20_s17 = sadd.s32 1, %s732_s17   ;;  %s943_s12 = smov %s716_s13 }
 0x16f   : > { %p17_p3 = scmp.ge.s32.totalorder %s20_s17, 4   ;;  %s944_s13 = smov %s720_s14 }
 0x170   : > { %s945_s14 = smov %s823_s26  ;;  %s946_s15 = smov %s728_s16 }
 0x171   : > { %s947_s16 = smov %s949_s20  ;;  %19 = sbr.rel (!%p17_p3) target bundleno = 7 (0x7), region = 85 }
 0x176   :  { %374 = vsyncpa [#allocation3], 1 }
 0x177   :  { %376 = vsyncpa [#allocation3 + $0x1], 1 }
 0x178   :  { %377 = vsyncpa [#allocation6], 1 }
 0x179   :  { %378 = vsyncpa [#allocation4], 1 }
 0x17a   :  { %380 = vsyncpa [#allocation4 + $0x1], 1 }

</bundles_post_ra>
